<compile_context>
chip_gen: v6e
topology: v6e:2x2x1
jax: 0.10.0
libtpu: 0.0.40
codegen_flags: <defaults>
</compile_context>

<pallas_src>
import math
import functools

import jax
import jax.numpy as jnp
from jax.experimental import pallas as pl
from jax.experimental.pallas import tpu as pltpu


def _mha_kernel(xf_ref, wqkv_ref, bqkv_ref, wo_ref, bo_ref,
                out_ref, attnw_ref,
                q_sc, k_sc, v_sc, o_sc,
                *, n_heads, d_k, tq, compute_dtype):
    """Grid step = (batch element, query tile). xf_ref is the full (S, D) slab."""
    qi = pl.program_id(1)
    d_model = n_heads * d_k
    scale = 1.0 / math.sqrt(d_k)

    # ---- Fused QKV projection: one (S, D) x (D, 3D) matmul per batch element,
    # cached head-major in VMEM scratch and reused by every query tile.
    @pl.when(qi == 0)
    def _():
        xf = xf_ref[...].astype(compute_dtype)                              # (S, D)
        qkv = jnp.dot(xf, wqkv_ref[...],
                      preferred_element_type=jnp.float32) + bqkv_ref[...]   # (S, 3D) f32
        for h in range(n_heads):                                            # static; data movement only
            q_sc[h] = qkv[:, h * d_k:(h + 1) * d_k].astype(compute_dtype)
            k_sc[h] = qkv[:, d_model + h * d_k:
                          d_model + (h + 1) * d_k].astype(compute_dtype)
            v_sc[h] = qkv[:, 2 * d_model + h * d_k:
                          2 * d_model + (h + 1) * d_k].astype(compute_dtype)

    # ---- Batched-over-heads attention for this query tile (no transposes).
    row0 = pl.multiple_of(qi * tq, tq)
    q3 = q_sc[:, pl.ds(row0, tq), :]                                        # (H, TQ, dk)
    k3 = k_sc[...]                                                          # (H, S,  dk)
    v3 = v_sc[...]                                                          # (H, S,  dk)

    scores = jnp.einsum('hqd,hkd->hqk', q3, k3,
                        preferred_element_type=jnp.float32) * scale         # (H, TQ, S) f32
    m = jnp.max(scores, axis=-1, keepdims=True)
    e = jnp.exp(scores - m)
    denom = jnp.sum(e, axis=-1, keepdims=True)
    w = e * pl.reciprocal(denom, approx=True)                               # (H, TQ, S) f32
    attnw_ref[...] = w.astype(attnw_ref.dtype)

    o3 = jnp.einsum('hqk,hkd->hqd', w.astype(compute_dtype), v3,
                    preferred_element_type=jnp.float32)                     # (H, TQ, dk) f32
    for h in range(n_heads):                                                # gather heads -> (TQ, D)
        o_sc[:, h * d_k:(h + 1) * d_k] = o3[h]

    # ---- Output projection.
    out = jnp.dot(o_sc[...].astype(compute_dtype), wo_ref[...],
                  preferred_element_type=jnp.float32) + bo_ref[...]
    out_ref[...] = out.astype(out_ref.dtype)


def multi_head_attention(x, params, *, n_heads, tq=None,
                         compute_dtype=jnp.float32, vmem_limit_bytes=None):
    """x: (B, S, D) float32.  params: wq,bq,wk,bk,wv,bv,wo,bo with W as (in, out)."""
    B, S, D = x.shape
    assert D % n_heads == 0
    d_k = D // n_heads

    if tq is None:
        tq = min(128, S)
    tq = min(tq, S)
    assert S % tq == 0 and (tq % 8 == 0 or tq == S), "query tile must divide S (8-aligned)"
    n_q = S // tq

    # Host-side prep: fuse Q|K|V weights, cast matmul operands to compute_dtype.
    wqkv = jnp.concatenate([params["wq"], params["wk"], params["wv"]],
                           axis=1).astype(compute_dtype)                    # (D, 3D)
    bqkv = jnp.concatenate([params["bq"], params["bk"], params["bv"]],
                           axis=1).astype(jnp.float32)                      # (1, 3D)
    wo = params["wo"].astype(compute_dtype)
    bo = params["bo"].astype(jnp.float32)
    x_c = x.astype(compute_dtype)

    kernel = functools.partial(_mha_kernel, n_heads=n_heads, d_k=d_k, tq=tq,
                               compute_dtype=compute_dtype)

    itemsize = jnp.dtype(compute_dtype).itemsize
    cost = pl.CostEstimate(
        flops=8 * B * S * D * D + 4 * B * S * S * D,
        transcendentals=B * n_heads * S * S,
        bytes_accessed=(B * S * D * itemsize                 # x
                        + 4 * D * D * itemsize               # weights
                        + 4 * D * 4                          # biases
                        + B * S * D * 4                      # output
                        + B * n_heads * S * S * 4))          # attn weights

    out, attnw = pl.pallas_call(
        kernel,
        out_shape=(
            jax.ShapeDtypeStruct((B, S, D), jnp.float32),
            jax.ShapeDtypeStruct((B, n_heads, S, S), jnp.float32),
        ),
        grid_spec=pltpu.PrefetchScalarGridSpec(
            num_scalar_prefetch=0,
            grid=(B, n_q),
            in_specs=[
                pl.BlockSpec((None, S, D), lambda b, qi: (b, 0, 0)),        # x (full seq slab)
                pl.BlockSpec((D, 3 * D), lambda b, qi: (0, 0)),             # wqkv (fused)
                pl.BlockSpec((1, 3 * D), lambda b, qi: (0, 0)),             # bqkv
                pl.BlockSpec((D, D), lambda b, qi: (0, 0)),                 # wo
                pl.BlockSpec((1, D), lambda b, qi: (0, 0)),                 # bo
            ],
            out_specs=[
                pl.BlockSpec((None, tq, D), lambda b, qi: (b, qi, 0)),
                pl.BlockSpec((None, n_heads, tq, S), lambda b, qi: (b, 0, qi, 0)),
            ],
            scratch_shapes=[
                pltpu.VMEM((n_heads, S, d_k), compute_dtype),   # Q cache (per batch elt)
                pltpu.VMEM((n_heads, S, d_k), compute_dtype),   # K cache (per batch elt)
                pltpu.VMEM((n_heads, S, d_k), compute_dtype),   # V cache (per batch elt)
                pltpu.VMEM((tq, D), jnp.float32),               # head-gather scratch
            ],
        ),
        compiler_params=pltpu.CompilerParams(
            dimension_semantics=("parallel", "arbitrary"),
            vmem_limit_bytes=vmem_limit_bytes),
        cost_estimate=cost,
    )(x_c, wqkv, bqkv, wo, bo)
    return out, attnw


def init_params(key, d_model):
    """Deterministic init mimicking nn.Linear default (uniform +-1/sqrt(fan_in)).
    Weights stored as (in, out) so kernel does x @ W + b."""
    bound = 1.0 / math.sqrt(d_model)
    keys = jax.random.split(key, 8)
    names = ["wq", "bq", "wk", "bk", "wv", "bv", "wo", "bo"]
    params = {}
    for i, name in enumerate(names):
        shape = (d_model, d_model) if name.startswith("w") else (1, d_model)
        params[name] = jax.random.uniform(
            keys[i], shape, dtype=jnp.float32, minval=-bound, maxval=bound)
    return params


def reference_mha(x, params, *, n_heads):
    """Pure-JAX f32 reference mirroring the PyTorch module semantics."""
    B, S, D = x.shape
    d_k = D // n_heads
    scale = 1.0 / math.sqrt(d_k)

    def proj(w, b):
        y = x @ w + b
        return y.reshape(B, S, n_heads, d_k).transpose(0, 2, 1, 3)  # (B,H,S,dk)

    q = proj(params["wq"], params["bq"])
    k = proj(params["wk"], params["bk"])
    v = proj(params["wv"], params["bv"])

    scores = jnp.einsum("bhqd,bhkd->bhqk", q, k) * scale
    attnw = jax.nn.softmax(scores, axis=-1)
    o = jnp.einsum("bhqk,bhkd->bhqd", attnw, v)
    o = o.transpose(0, 2, 1, 3).reshape(B, S, D)
    out = o @ params["wo"] + params["bo"]
    return out, attnw


if __name__ == "__main__":
    B, S, d_model, n_heads = 2, 8, 32, 4

    key = jax.random.PRNGKey(0)
    kx, kp = jax.random.split(key)
    x = jax.random.normal(kx, (B, S, d_model), dtype=jnp.float32)
    params = init_params(kp, d_model)

    ref_out, ref_attnw = reference_mha(x, params, n_heads=n_heads)

    # f32 compute path (matches the PyTorch module numerics).
    out, attnw = multi_head_attention(x, params, n_heads=n_heads,
                                      compute_dtype=jnp.float32)
    out, attnw = jax.block_until_ready((out, attnw))
    assert jnp.allclose(out, ref_out, atol=2e-3, rtol=2e-3)
    assert jnp.allclose(attnw, ref_attnw, atol=2e-3, rtol=2e-3)

    # bf16 matmul-operand path (f32 accumulation + f32 softmax).
    out_bf, attnw_bf = multi_head_attention(x, params, n_heads=n_heads,
                                            compute_dtype=jnp.bfloat16)
    out_bf, attnw_bf = jax.block_until_ready((out_bf, attnw_bf))
    assert jnp.allclose(out_bf, ref_out, atol=5e-2, rtol=5e-2)
    assert jnp.allclose(attnw_bf, ref_attnw, atol=5e-2, rtol=5e-2)

    # TODO(synk): optional `mask` argument of the PyTorch reference is not plumbed
    # through (forward is exercised with mask=None); cross_attention not implemented.
    print("KERNEL_OK")
</pallas_src>

<mosaic_0001>
module attributes {stable_mosaic.version = 11 : i64} {
  func.func @_mha_kernel(%arg0: i32, %arg1: i32, %arg2: memref<1x8x32xf32, #tpu.memory_space<vmem>>, %arg3: memref<32x96xf32, #tpu.memory_space<vmem>>, %arg4: memref<1x96xf32, #tpu.memory_space<vmem>>, %arg5: memref<32x32xf32, #tpu.memory_space<vmem>>, %arg6: memref<1x32xf32, #tpu.memory_space<vmem>>, %arg7: memref<1x8x32xf32, #tpu.memory_space<vmem>>, %arg8: memref<1x4x8x8xf32, #tpu.memory_space<vmem>>, %arg9: memref<4x8x8xf32, #tpu.memory_space<vmem>>, %arg10: memref<4x8x8xf32, #tpu.memory_space<vmem>>, %arg11: memref<4x8x8xf32, #tpu.memory_space<vmem>>, %arg12: memref<8x32xf32, #tpu.memory_space<vmem>>) attributes {dimension_semantics = [#tpu.dimension_semantics<parallel>, #tpu.dimension_semantics<arbitrary>], iteration_bounds = array<i64: 2, 1>, scalar_prefetch = 0 : i64, scratch_operands = 4 : i64, tpu.core_type = #tpu.core_type<tc>, window_params = [{transform_indices = @transform_0, window_bounds = array<i64: 1, 8, 32>}, {pipeline_mode = #tpu.pipeline_mode<synchronous>, transform_indices = @transform_1, window_bounds = array<i64: 32, 96>}, {pipeline_mode = #tpu.pipeline_mode<synchronous>, transform_indices = @transform_2, window_bounds = array<i64: 1, 96>}, {pipeline_mode = #tpu.pipeline_mode<synchronous>, transform_indices = @transform_3, window_bounds = array<i64: 32, 32>}, {pipeline_mode = #tpu.pipeline_mode<synchronous>, transform_indices = @transform_4, window_bounds = array<i64: 1, 32>}, {transform_indices = @transform_5, window_bounds = array<i64: 1, 8, 32>}, {transform_indices = @transform_6, window_bounds = array<i64: 1, 4, 8, 8>}]} {
    %c0_i32 = arith.constant 0 : i32
    %0 = arith.cmpi eq, %arg1, %c0_i32 : i32
    %1 = arith.extui %0 : i1 to i32
    %c0_i32_0 = arith.constant 0 : i32
    %2 = arith.cmpi ne, %1, %c0_i32_0 : i32
    scf.if %2 {
      %c0_31 = arith.constant 0 : index
      %c0_32 = arith.constant 0 : index
      %c0_33 = arith.constant 0 : index
      %47 = vector.load %arg2[%c0_31, %c0_32, %c0_33] : memref<1x8x32xf32, #tpu.memory_space<vmem>>, vector<1x8x32xf32>
      %48 = vector.shape_cast %47 : vector<1x8x32xf32> to vector<8x32xf32>
      %c0_34 = arith.constant 0 : index
      %c0_35 = arith.constant 0 : index
      %49 = vector.load %arg3[%c0_34, %c0_35] : memref<32x96xf32, #tpu.memory_space<vmem>>, vector<32x96xf32>
      %cst_36 = arith.constant dense<0.000000e+00> : vector<8x96xf32>
      %50 = tpu.matmul %48, %49, %cst_36 {dimension_numbers = #tpu.dot_dimension_numbers<[1], [0], [0], [1], [0, 0, 1, 1], [], []>} : vector<8x32xf32>, vector<32x96xf32>, vector<8x96xf32> -> vector<8x96xf32>
      %c0_37 = arith.constant 0 : index
      %c0_38 = arith.constant 0 : index
      %51 = vector.load %arg4[%c0_37, %c0_38] : memref<1x96xf32, #tpu.memory_space<vmem>>, vector<1x96xf32>
      %52 = vector.broadcast %51 : vector<1x96xf32> to vector<8x96xf32>
      %53 = arith.addf %50, %52 : vector<8x96xf32>
      %54 = vector.extract_strided_slice %53 {offsets = [0, 0], sizes = [8, 8], strides = [1, 1]} : vector<8x96xf32> to vector<8x8xf32>
      %c0_39 = arith.constant 0 : index
      %c0_40 = arith.constant 0 : index
      %c0_41 = arith.constant 0 : index
      %55 = vector.load %arg9[%c0_39, %c0_40, %c0_41] : memref<4x8x8xf32, #tpu.memory_space<vmem>>, vector<1x8x8xf32>
      %56 = vector.shape_cast %55 : vector<1x8x8xf32> to vector<8x8xf32>
      %57 = vector.shape_cast %54 : vector<8x8xf32> to vector<1x8x8xf32>
      tpu.vector_store %arg9[%c0_39, %c0_40, %c0_41], %57 {strides = array<i32>} : memref<4x8x8xf32, #tpu.memory_space<vmem>>, vector<1x8x8xf32>,
      %58 = vector.extract_strided_slice %53 {offsets = [0, 32], sizes = [8, 8], strides = [1, 1]} : vector<8x96xf32> to vector<8x8xf32>
      %c0_42 = arith.constant 0 : index
      %c0_43 = arith.constant 0 : index
      %c0_44 = arith.constant 0 : index
      %59 = vector.load %arg10[%c0_42, %c0_43, %c0_44] : memref<4x8x8xf32, #tpu.memory_space<vmem>>, vector<1x8x8xf32>
      %60 = vector.shape_cast %59 : vector<1x8x8xf32> to vector<8x8xf32>
      %61 = vector.shape_cast %58 : vector<8x8xf32> to vector<1x8x8xf32>
      tpu.vector_store %arg10[%c0_42, %c0_43, %c0_44], %61 {strides = array<i32>} : memref<4x8x8xf32, #tpu.memory_space<vmem>>, vector<1x8x8xf32>,
      %62 = vector.extract_strided_slice %53 {offsets = [0, 64], sizes = [8, 8], strides = [1, 1]} : vector<8x96xf32> to vector<8x8xf32>
      %c0_45 = arith.constant 0 : index
      %c0_46 = arith.constant 0 : index
      %c0_47 = arith.constant 0 : index
      %63 = vector.load %arg11[%c0_45, %c0_46, %c0_47] : memref<4x8x8xf32, #tpu.memory_space<vmem>>, vector<1x8x8xf32>
      %64 = vector.shape_cast %63 : vector<1x8x8xf32> to vector<8x8xf32>
      %65 = vector.shape_cast %62 : vector<8x8xf32> to vector<1x8x8xf32>
      tpu.vector_store %arg11[%c0_45, %c0_46, %c0_47], %65 {strides = array<i32>} : memref<4x8x8xf32, #tpu.memory_space<vmem>>, vector<1x8x8xf32>,
      %66 = vector.extract_strided_slice %53 {offsets = [0, 8], sizes = [8, 8], strides = [1, 1]} : vector<8x96xf32> to vector<8x8xf32>
      %c1 = arith.constant 1 : index
      %c0_48 = arith.constant 0 : index
      %c0_49 = arith.constant 0 : index
      %67 = vector.load %arg9[%c1, %c0_48, %c0_49] : memref<4x8x8xf32, #tpu.memory_space<vmem>>, vector<1x8x8xf32>
      %68 = vector.shape_cast %67 : vector<1x8x8xf32> to vector<8x8xf32>
      %69 = vector.shape_cast %66 : vector<8x8xf32> to vector<1x8x8xf32>
      tpu.vector_store %arg9[%c1, %c0_48, %c0_49], %69 {strides = array<i32>} : memref<4x8x8xf32, #tpu.memory_space<vmem>>, vector<1x8x8xf32>,
      %70 = vector.extract_strided_slice %53 {offsets = [0, 40], sizes = [8, 8], strides = [1, 1]} : vector<8x96xf32> to vector<8x8xf32>
      %c1_50 = arith.constant 1 : index
      %c0_51 = arith.constant 0 : index
      %c0_52 = arith.constant 0 : index
      %71 = vector.load %arg10[%c1_50, %c0_51, %c0_52] : memref<4x8x8xf32, #tpu.memory_space<vmem>>, vector<1x8x8xf32>
      %72 = vector.shape_cast %71 : vector<1x8x8xf32> to vector<8x8xf32>
      %73 = vector.shape_cast %70 : vector<8x8xf32> to vector<1x8x8xf32>
      tpu.vector_store %arg10[%c1_50, %c0_51, %c0_52], %73 {strides = array<i32>} : memref<4x8x8xf32, #tpu.memory_space<vmem>>, vector<1x8x8xf32>,
      %74 = vector.extract_strided_slice %53 {offsets = [0, 72], sizes = [8, 8], strides = [1, 1]} : vector<8x96xf32> to vector<8x8xf32>
      %c1_53 = arith.constant 1 : index
      %c0_54 = arith.constant 0 : index
      %c0_55 = arith.constant 0 : index
      %75 = vector.load %arg11[%c1_53, %c0_54, %c0_55] : memref<4x8x8xf32, #tpu.memory_space<vmem>>, vector<1x8x8xf32>
      %76 = vector.shape_cast %75 : vector<1x8x8xf32> to vector<8x8xf32>
      %77 = vector.shape_cast %74 : vector<8x8xf32> to vector<1x8x8xf32>
      tpu.vector_store %arg11[%c1_53, %c0_54, %c0_55], %77 {strides = array<i32>} : memref<4x8x8xf32, #tpu.memory_space<vmem>>, vector<1x8x8xf32>,
      %78 = vector.extract_strided_slice %53 {offsets = [0, 16], sizes = [8, 8], strides = [1, 1]} : vector<8x96xf32> to vector<8x8xf32>
      %c2 = arith.constant 2 : index
      %c0_56 = arith.constant 0 : index
      %c0_57 = arith.constant 0 : index
      %79 = vector.load %arg9[%c2, %c0_56, %c0_57] : memref<4x8x8xf32, #tpu.memory_space<vmem>>, vector<1x8x8xf32>
      %80 = vector.shape_cast %79 : vector<1x8x8xf32> to vector<8x8xf32>
      %81 = vector.shape_cast %78 : vector<8x8xf32> to vector<1x8x8xf32>
      tpu.vector_store %arg9[%c2, %c0_56, %c0_57], %81 {strides = array<i32>} : memref<4x8x8xf32, #tpu.memory_space<vmem>>, vector<1x8x8xf32>,
      %82 = vector.extract_strided_slice %53 {offsets = [0, 48], sizes = [8, 8], strides = [1, 1]} : vector<8x96xf32> to vector<8x8xf32>
      %c2_58 = arith.constant 2 : index
      %c0_59 = arith.constant 0 : index
      %c0_60 = arith.constant 0 : index
      %83 = vector.load %arg10[%c2_58, %c0_59, %c0_60] : memref<4x8x8xf32, #tpu.memory_space<vmem>>, vector<1x8x8xf32>
      %84 = vector.shape_cast %83 : vector<1x8x8xf32> to vector<8x8xf32>
      %85 = vector.shape_cast %82 : vector<8x8xf32> to vector<1x8x8xf32>
      tpu.vector_store %arg10[%c2_58, %c0_59, %c0_60], %85 {strides = array<i32>} : memref<4x8x8xf32, #tpu.memory_space<vmem>>, vector<1x8x8xf32>,
      %86 = vector.extract_strided_slice %53 {offsets = [0, 80], sizes = [8, 8], strides = [1, 1]} : vector<8x96xf32> to vector<8x8xf32>
      %c2_61 = arith.constant 2 : index
      %c0_62 = arith.constant 0 : index
      %c0_63 = arith.constant 0 : index
      %87 = vector.load %arg11[%c2_61, %c0_62, %c0_63] : memref<4x8x8xf32, #tpu.memory_space<vmem>>, vector<1x8x8xf32>
      %88 = vector.shape_cast %87 : vector<1x8x8xf32> to vector<8x8xf32>
      %89 = vector.shape_cast %86 : vector<8x8xf32> to vector<1x8x8xf32>
      tpu.vector_store %arg11[%c2_61, %c0_62, %c0_63], %89 {strides = array<i32>} : memref<4x8x8xf32, #tpu.memory_space<vmem>>, vector<1x8x8xf32>,
      %90 = vector.extract_strided_slice %53 {offsets = [0, 24], sizes = [8, 8], strides = [1, 1]} : vector<8x96xf32> to vector<8x8xf32>
      %c3 = arith.constant 3 : index
      %c0_64 = arith.constant 0 : index
      %c0_65 = arith.constant 0 : index
      %91 = vector.load %arg9[%c3, %c0_64, %c0_65] : memref<4x8x8xf32, #tpu.memory_space<vmem>>, vector<1x8x8xf32>
      %92 = vector.shape_cast %91 : vector<1x8x8xf32> to vector<8x8xf32>
      %93 = vector.shape_cast %90 : vector<8x8xf32> to vector<1x8x8xf32>
      tpu.vector_store %arg9[%c3, %c0_64, %c0_65], %93 {strides = array<i32>} : memref<4x8x8xf32, #tpu.memory_space<vmem>>, vector<1x8x8xf32>,
      %94 = vector.extract_strided_slice %53 {offsets = [0, 56], sizes = [8, 8], strides = [1, 1]} : vector<8x96xf32> to vector<8x8xf32>
      %c3_66 = arith.constant 3 : index
      %c0_67 = arith.constant 0 : index
      %c0_68 = arith.constant 0 : index
      %95 = vector.load %arg10[%c3_66, %c0_67, %c0_68] : memref<4x8x8xf32, #tpu.memory_space<vmem>>, vector<1x8x8xf32>
      %96 = vector.shape_cast %95 : vector<1x8x8xf32> to vector<8x8xf32>
      %97 = vector.shape_cast %94 : vector<8x8xf32> to vector<1x8x8xf32>
      tpu.vector_store %arg10[%c3_66, %c0_67, %c0_68], %97 {strides = array<i32>} : memref<4x8x8xf32, #tpu.memory_space<vmem>>, vector<1x8x8xf32>,
      %98 = vector.extract_strided_slice %53 {offsets = [0, 88], sizes = [8, 8], strides = [1, 1]} : vector<8x96xf32> to vector<8x8xf32>
      %c3_69 = arith.constant 3 : index
      %c0_70 = arith.constant 0 : index
      %c0_71 = arith.constant 0 : index
      %99 = vector.load %arg11[%c3_69, %c0_70, %c0_71] : memref<4x8x8xf32, #tpu.memory_space<vmem>>, vector<1x8x8xf32>
      %100 = vector.shape_cast %99 : vector<1x8x8xf32> to vector<8x8xf32>
      %101 = vector.shape_cast %98 : vector<8x8xf32> to vector<1x8x8xf32>
      tpu.vector_store %arg11[%c3_69, %c0_70, %c0_71], %101 {strides = array<i32>} : memref<4x8x8xf32, #tpu.memory_space<vmem>>, vector<1x8x8xf32>,
    } else {
    }
    %c8_i32 = arith.constant 8 : i32
    %3 = arith.muli %arg1, %c8_i32 : i32
    %4 = tpu.assume_multiple %3, 8 : i32
    %c0 = arith.constant 0 : index
    %5 = arith.index_cast %4 : i32 to index
    %c0_1 = arith.constant 0 : index
    %6 = vector.load %arg9[%c0, %5, %c0_1] : memref<4x8x8xf32, #tpu.memory_space<vmem>>, vector<4x8x8xf32>
    %c0_2 = arith.constant 0 : index
    %c0_3 = arith.constant 0 : index
    %c0_4 = arith.constant 0 : index
    %7 = vector.load %arg10[%c0_2, %c0_3, %c0_4] : memref<4x8x8xf32, #tpu.memory_space<vmem>>, vector<4x8x8xf32>
    %c0_5 = arith.constant 0 : index
    %c0_6 = arith.constant 0 : index
    %c0_7 = arith.constant 0 : index
    %8 = vector.load %arg11[%c0_5, %c0_6, %c0_7] : memref<4x8x8xf32, #tpu.memory_space<vmem>>, vector<4x8x8xf32>
    "tpu.trace_start"() <{level = 10 : i32, message = "hqd,hkd->hqk"}> : () -> ()
    %cst = arith.constant dense<0.000000e+00> : vector<4x8x8xf32>
    %9 = tpu.matmul %6, %7, %cst {dimension_numbers = #tpu.dot_dimension_numbers<[2], [2], [1], [1], [0, 0, 0, 1, 1, 1], [0], [0]>} : vector<4x8x8xf32>, vector<4x8x8xf32>, vector<4x8x8xf32> -> vector<4x8x8xf32>
    "tpu.trace_stop"() : () -> ()
    %cst_8 = arith.constant 0.353553385 : f32
    %10 = vector.broadcast %cst_8 : f32 to vector<4x8x8xf32>
    %11 = arith.mulf %9, %10 : vector<4x8x8xf32>
    %cst_9 = arith.constant dense<0xFF800000> : vector<4x8xf32>
    %12 = vector.multi_reduction <maximumf>, %11, %cst_9 [2] : vector<4x8x8xf32> to vector<4x8xf32>
    %13 = vector.shape_cast %12 : vector<4x8xf32> to vector<4x8x1xf32>
    %14 = vector.broadcast %13 : vector<4x8x1xf32> to vector<4x8x8xf32>
    %15 = arith.subf %11, %14 : vector<4x8x8xf32>
    %16 = math.exp %15 : vector<4x8x8xf32>
    %cst_10 = arith.constant dense<0.000000e+00> : vector<4x8xf32>
    %17 = vector.multi_reduction <add>, %16, %cst_10 [2] : vector<4x8x8xf32> to vector<4x8xf32>
    %18 = vector.shape_cast %17 : vector<4x8xf32> to vector<4x8x1xf32>
    %19 = tpu.reciprocal %18 {approx = true} : vector<4x8x1xf32> -> vector<4x8x1xf32>
    %20 = vector.broadcast %19 : vector<4x8x1xf32> to vector<4x8x8xf32>
    %21 = arith.mulf %16, %20 : vector<4x8x8xf32>
    %c0_11 = arith.constant 0 : index
    %c0_12 = arith.constant 0 : index
    %c0_13 = arith.constant 0 : index
    %c0_14 = arith.constant 0 : index
    %22 = vector.load %arg8[%c0_11, %c0_12, %c0_13, %c0_14] : memref<1x4x8x8xf32, #tpu.memory_space<vmem>>, vector<1x4x8x8xf32>
    %23 = vector.shape_cast %22 : vector<1x4x8x8xf32> to vector<4x8x8xf32>
    %24 = vector.shape_cast %21 : vector<4x8x8xf32> to vector<1x4x8x8xf32>
    tpu.vector_store %arg8[%c0_11, %c0_12, %c0_13, %c0_14], %24 {strides = array<i32>} : memref<1x4x8x8xf32, #tpu.memory_space<vmem>>, vector<1x4x8x8xf32>,
    "tpu.trace_start"() <{level = 10 : i32, message = "hqk,hkd->hqd"}> : () -> ()
    %cst_15 = arith.constant dense<0.000000e+00> : vector<4x8x8xf32>
    %25 = tpu.matmul %21, %8, %cst_15 {dimension_numbers = #tpu.dot_dimension_numbers<[2], [1], [1], [2], [0, 0, 0, 1, 1, 2], [0], [0]>} : vector<4x8x8xf32>, vector<4x8x8xf32>, vector<4x8x8xf32> -> vector<4x8x8xf32>
    "tpu.trace_stop"() : () -> ()
    %26 = vector.extract_strided_slice %25 {offsets = [0, 0, 0], sizes = [1, 8, 8], strides = [1, 1, 1]} : vector<4x8x8xf32> to vector<1x8x8xf32>
    %27 = vector.shape_cast %26 : vector<1x8x8xf32> to vector<8x8xf32>
    %c0_16 = arith.constant 0 : index
    %c0_17 = arith.constant 0 : index
    %28 = vector.load %arg12[%c0_16, %c0_17] : memref<8x32xf32, #tpu.memory_space<vmem>>, vector<8x8xf32>
    tpu.vector_store %arg12[%c0_16, %c0_17], %27 {strides = array<i32>} : memref<8x32xf32, #tpu.memory_space<vmem>>, vector<8x8xf32>,
    %29 = vector.extract_strided_slice %25 {offsets = [1, 0, 0], sizes = [1, 8, 8], strides = [1, 1, 1]} : vector<4x8x8xf32> to vector<1x8x8xf32>
    %30 = vector.shape_cast %29 : vector<1x8x8xf32> to vector<8x8xf32>
    %c0_18 = arith.constant 0 : index
    %c8 = arith.constant 8 : index
    %31 = vector.load %arg12[%c0_18, %c8] : memref<8x32xf32, #tpu.memory_space<vmem>>, vector<8x8xf32>
    tpu.vector_store %arg12[%c0_18, %c8], %30 {strides = array<i32>} : memref<8x32xf32, #tpu.memory_space<vmem>>, vector<8x8xf32>,
    %32 = vector.extract_strided_slice %25 {offsets = [2, 0, 0], sizes = [1, 8, 8], strides = [1, 1, 1]} : vector<4x8x8xf32> to vector<1x8x8xf32>
    %33 = vector.shape_cast %32 : vector<1x8x8xf32> to vector<8x8xf32>
    %c0_19 = arith.constant 0 : index
    %c16 = arith.constant 16 : index
    %34 = vector.load %arg12[%c0_19, %c16] : memref<8x32xf32, #tpu.memory_space<vmem>>, vector<8x8xf32>
    tpu.vector_store %arg12[%c0_19, %c16], %33 {strides = array<i32>} : memref<8x32xf32, #tpu.memory_space<vmem>>, vector<8x8xf32>,
    %35 = vector.extract_strided_slice %25 {offsets = [3, 0, 0], sizes = [1, 8, 8], strides = [1, 1, 1]} : vector<4x8x8xf32> to vector<1x8x8xf32>
    %36 = vector.shape_cast %35 : vector<1x8x8xf32> to vector<8x8xf32>
    %c0_20 = arith.constant 0 : index
    %c24 = arith.constant 24 : index
    %37 = vector.load %arg12[%c0_20, %c24] : memref<8x32xf32, #tpu.memory_space<vmem>>, vector<8x8xf32>
    tpu.vector_store %arg12[%c0_20, %c24], %36 {strides = array<i32>} : memref<8x32xf32, #tpu.memory_space<vmem>>, vector<8x8xf32>,
    %c0_21 = arith.constant 0 : index
    %c0_22 = arith.constant 0 : index
    %38 = vector.load %arg12[%c0_21, %c0_22] : memref<8x32xf32, #tpu.memory_space<vmem>>, vector<8x32xf32>
    %c0_23 = arith.constant 0 : index
    %c0_24 = arith.constant 0 : index
    %39 = vector.load %arg5[%c0_23, %c0_24] : memref<32x32xf32, #tpu.memory_space<vmem>>, vector<32x32xf32>
    %cst_25 = arith.constant dense<0.000000e+00> : vector<8x32xf32>
    %40 = tpu.matmul %38, %39, %cst_25 {dimension_numbers = #tpu.dot_dimension_numbers<[1], [0], [0], [1], [0, 0, 1, 1], [], []>} : vector<8x32xf32>, vector<32x32xf32>, vector<8x32xf32> -> vector<8x32xf32>
    %c0_26 = arith.constant 0 : index
    %c0_27 = arith.constant 0 : index
    %41 = vector.load %arg6[%c0_26, %c0_27] : memref<1x32xf32, #tpu.memory_space<vmem>>, vector<1x32xf32>
    %42 = vector.broadcast %41 : vector<1x32xf32> to vector<8x32xf32>
    %43 = arith.addf %40, %42 : vector<8x32xf32>
    %c0_28 = arith.constant 0 : index
    %c0_29 = arith.constant 0 : index
    %c0_30 = arith.constant 0 : index
    %44 = vector.load %arg7[%c0_28, %c0_29, %c0_30] : memref<1x8x32xf32, #tpu.memory_space<vmem>>, vector<1x8x32xf32>
    %45 = vector.shape_cast %44 : vector<1x8x32xf32> to vector<8x32xf32>
    %46 = vector.shape_cast %43 : vector<8x32xf32> to vector<1x8x32xf32>
    tpu.vector_store %arg7[%c0_28, %c0_29, %c0_30], %46 {strides = array<i32>} : memref<1x8x32xf32, #tpu.memory_space<vmem>>, vector<1x8x32xf32>,
    return
  }
  func.func @transform_0(%arg0: i32, %arg1: i32) -> (i32, i32, i32) {
    %c0_i32 = arith.constant 0 : i32
    %c0_i32_0 = arith.constant 0 : i32
    %c0_i32_1 = arith.constant 0 : i32
    return %arg0, %c0_i32, %c0_i32_0 : i32, i32, i32
  }
  func.func @transform_1(%arg0: i32, %arg1: i32) -> (i32, i32) {
    %c0_i32 = arith.constant 0 : i32
    %c0_i32_0 = arith.constant 0 : i32
    %c0_i32_1 = arith.constant 0 : i32
    return %c0_i32, %c0_i32_0 : i32, i32
  }
  func.func @transform_2(%arg0: i32, %arg1: i32) -> (i32, i32) {
    %c0_i32 = arith.constant 0 : i32
    %c0_i32_0 = arith.constant 0 : i32
    %c0_i32_1 = arith.constant 0 : i32
    return %c0_i32, %c0_i32_0 : i32, i32
  }
  func.func @transform_3(%arg0: i32, %arg1: i32) -> (i32, i32) {
    %c0_i32 = arith.constant 0 : i32
    %c0_i32_0 = arith.constant 0 : i32
    %c0_i32_1 = arith.constant 0 : i32
    return %c0_i32, %c0_i32_0 : i32, i32
  }
  func.func @transform_4(%arg0: i32, %arg1: i32) -> (i32, i32) {
    %c0_i32 = arith.constant 0 : i32
    %c0_i32_0 = arith.constant 0 : i32
    %c0_i32_1 = arith.constant 0 : i32
    return %c0_i32, %c0_i32_0 : i32, i32
  }
  func.func @transform_5(%arg0: i32, %arg1: i32) -> (i32, i32, i32) {
    %c0_i32 = arith.constant 0 : i32
    %c0_i32_0 = arith.constant 0 : i32
    return %arg0, %arg1, %c0_i32 : i32, i32, i32
  }
  func.func @transform_6(%arg0: i32, %arg1: i32) -> (i32, i32, i32, i32) {
    %c0_i32 = arith.constant 0 : i32
    %c0_i32_0 = arith.constant 0 : i32
    %c0_i32_1 = arith.constant 0 : i32
    return %arg0, %c0_i32, %arg1, %c0_i32_0 : i32, i32, i32, i32
  }
}

</mosaic_0001>

<bundles_post_ra>
// kernel: tpu_custom_call.1
= control target key start
LH: loop header
LB: loop body
LE: loop exit
PB: predicated region body
PF: predicated region fallthrough
CT: control target
= control target key end

     0   :  { %s2234_s0 = inlined_call_operand.hbm [shape: f32[2,8,32], index: 0, kind: input, shape index: {}]   ;;  %s2235_s1 = inlined_call_operand.hbm [shape: f32[32,96], index: 1, kind: input, shape index: {}]   ;;  %s2236_s2 = inlined_call_operand.vmem [shape: f32[1,96], index: 2, kind: input, shape index: {}]   ;;  %s2237_s3 = inlined_call_operand.hbm [shape: f32[32,32], index: 3, kind: input, shape index: {}]   ;;  %s2238_s4 = inlined_call_operand.vmem [shape: f32[1,32], index: 4, kind: input, shape index: {}]   ;;  %s2239_s5 = inlined_call_operand.hbm [shape: f32[2,8,32], index: 5, kind: output, shape index: {0}]   ;;  %s2240_s6 = inlined_call_operand.hbm [shape: f32[2,4,8,8], index: 6, kind: output, shape index: {1}]  }
   0x1   :  { %2244 = sst [smem:[#allocation19_spill]] %s2235_s1 }
   0x2   :  { %2245 = sst [smem:[#allocation20_spill]] %s2237_s3 }
   0x3   :  { %12 = vsyncpa [#allocation7], 0 }
   0x4   :  { %14 = vsyncpa [#allocation7 + $0x1], 0 }
   0x5   :  { %15 = vsyncpa [#allocation10], 0 }
   0x6   :  { %16 = vsyncpa [#allocation8], 0 }
   0x7   :  { %18 = vsyncpa [#allocation8 + $0x1], 0 }
   0x8   :  { %19 = vsyncpa [#allocation14], 0 }
   0x9   :  { %21 = vsyncpa [#allocation14 + $0x1], 0  ;;  %s1913_s21 = smov 0   ;;  %s1915_s22 = smov 0  }
   0xa   :  { %s1917_s23 = smov 0   ;;  %s1919_s24 = smov 0  }
   0xb   :  { %s1921_s25 = smov 0   ;;  %s1923_s26 = smov 0  }
   0xc LB: > { %s1409_s27 = sadd.s32 4294967295, %s1852_s26   ;;  %s1410_s28 = sadd.s32 4294967294, %s1852_s26   ;;  %s1852_s26 = sphi %s1923_s26, %s27_s26   ;;  %s1848_s25 = sphi %s1921_s25, %s2264_s25   ;;  %s1844_s24 = sphi %s1919_s24, %s2263_s24   ;;  %s1840_s23 = sphi %s1917_s23, %s2262_s23   ;;  %s1836_s22 = sphi %s1915_s22, %s2261_s22   ;;  %s1832_s21 = sphi %s1913_s21, %s2260_s21  }
   0xd   : > { %p59_p0 = scmp.ne.s32.totalorder %s1836_s22, %s1832_s21  ;;  %p1947_p1 = scmp.eq.s32.totalorder %s1409_s27, 0 }
   0xe   : > { %p1951_p2 = scmp.eq.s32.totalorder %s1409_s27, 1  ;;  %p175_p3 = scmp.eq.s32.totalorder %s1410_s28, 1 }
   0xf   : > { %s2246_s29 = scalar_select %p1947_p1, 1, 0 }
  0x10   : > { %p1957_p4 = por %p1947_p1, %p59_p0  ;;  %p1411_p5 = scmp.ge.s32.totalorder %s1852_s26, 1 }
  0x11   : > { %p1962_p6 = por %p175_p3, %p59_p0  ;;  %p210_p7 = scmp.lt.s32.totalorder %s1852_s26, 3 }
  0x12   : > { %s2248_s7 = scalar_select %p1957_p4, 1, 0 }
  0x13   : > { %s2249_s8 = scalar_select %p1962_p6, 1, 0 }
  0x14   : > { %p1967_p8 = pnand %p1411_p5, %p210_p7  ;;  %s1854_s10 = smov [#allocation9]  }
  0x15   : > { %s222_s11 = sshll.u32 %s1854_s10, 4  ;;  %s1855_s13 = smov [#allocation11]   ;;  %s223_s11 = int_to_ptr.vmem [resolvable:$true] %s222_s11 }
  0x16   : > { %p1549_p9 = pneg %p1967_p8  ;;  %s238_s14 = sshll.u32 %s1855_s13, 4  ;;  %s239_s14 = int_to_ptr.vmem [resolvable:$true] %s238_s14 }
  0x17   : > { %s1669_s15 = scalar_lea.vmem %s223_s11, 512  ;;  %p1677_p5 = scmp.lt.s32.totalorder %s223_s11, %s223_s11 }
  0x18   : > { %p1976_p11 = pnand %p1549_p9, %p1947_p1  ;;  %p1670_p13 = scmp.ne.s32.totalorder %s223_s11, %s1669_s15 }
  0x19   : > { %p1678_p7 = scmp.lt.s32.totalorder %s1669_s15, %s1669_s15 }
  0x1a   : > { %p1660_p12 = pneg %p1976_p11 }
  0x1b   : > { %p1679_p10 = por %p1678_p7, %p1677_p5 }
  0x1c   : > { %p1672_p0 = pnand %p1670_p13, %p1660_p12 }
  0x1e   : > { %p1673_p3 = pneg %p1672_p0 }
  0x20   : > { %p1680_p9 = pnand %p1679_p10, %p1673_p3 }
  0x22   : > { %1683 = shalt.err (!%p1680_p9)
}
  0x23   : > { %s1856_s16 = smov 128   ;;  %s1857_s17 = smov 8  }
  0x24   : > { %s2252_s1 = sld [smem:[#allocation19_spill]]  ;;  %s1695_s20 = scalar_lea.vmem %s239_s14, 512 }
  0x25   : > { %p1696_p6 = scmp.ne.s32.totalorder %s239_s14, %s1695_s20  ;;  %p1703_p1 = scmp.lt.s32.totalorder %s239_s14, %s239_s14 }
  0x26   : > { %p1704_p4 = scmp.lt.s32.totalorder %s1695_s20, %s1695_s20 }
  0x27   : > { %p1698_p13 = pnand %p1696_p6, %p1660_p12 }
  0x28   : > { %p1705_p5 = por %p1704_p4, %p1703_p1 }
  0x29   : > { %p1699_p0 = pneg %p1698_p13 }
  0x2a   : > { %1552 = dma.hbm_to_vmem [thread:$0]  (!%p1976_p11), %s2252_s1, 512, %s223_s11, [#allocation10], %s1856_s16, %s1856_s16, %s1857_s17  }
  0x2b   : > { %p1706_p10 = pnand %p1705_p5, %p1699_p0 }
  0x2d   : > { %1709 = shalt.err (!%p1706_p10)
}
  0x2e   : > { %s2253_s3 = sld [smem:[#allocation20_spill]]  ;;  %s39_s10 = sadd.s32 1, %s1848_s25 }
  0x2f   : > { %s46_s11 = sadd.s32 1, %s1840_s23  ;;  %p41_p1 = scmp.ge.s32.totalorder %s39_s10, 2 }
  0x30   : > { %p53_p4 = scmp.ne.s32.totalorder %s1840_s23, %s1836_s22  ;;  %p54_p6 = scmp.eq.s32.totalorder %s1852_s26, 0 }
  0x31   : > { %p1569_p12 = scmp.lt.s32.totalorder %s1852_s26, 2  ;;  %s2266_s10 = smov (%p41_p1, %s39_s10), 0 }
  0x32   : > { %p55_p3 = por %p54_p6, %p53_p4  ;;  %p2008_p7 = por %p1951_p2, %p53_p4 }
  0x33   : > { %s43_s13 = ssub.s32 %s1848_s25, %s2266_s10  ;;  %s255_s15 = sand.u32 1, %s1840_s23  }
  0x34   : > { %1555 = dma.hbm_to_vmem [thread:$0]  (!%p1976_p11), %s2253_s3, 512, %s239_s14, [#allocation10], %s1856_s16, %s1856_s16, %s1857_s17  }
  0x35   : > { %p44_p9 = scmp.eq.s32.totalorder %s43_s13, 0  ;;  %s1415_s14 = sshll.u32 %s255_s15, 3 }
  0x36   : > { %s1416_s16 = sshll.u32 %s1848_s25, 7  ;;  %s259_s27 = scalar_lea.vmem [#allocation6], %s1415_s14 }
  0x37   : > { %s2017_s17 = scalar_select %p44_p9, %s1840_s23, %s46_s11  }
  0x38   : > { %s264_s20 = scalar_lea.hbm %s2234_s0, %s1416_s16  ;;  %s266_s28 = sshll.u32 %s259_s27, 4  ;;  %s267_s28 = int_to_ptr.vmem [resolvable:$true] %s266_s28 }
  0x39   : > { %p2024_p11 = pnand %p1569_p12, %p55_p3  ;;  %s256_s1 = scalar_lea.sflag [#allocation7], %s255_s15 }
  0x3a   : > { %s1723_s13 = scalar_lea.vmem %s267_s28, 128  ;;  %s1858_s11 = smov [#allocation6]  }
  0x3b   : > { %p1712_p2 = pneg %p2024_p11  ;;  %p1724_p13 = scmp.ne.s32.totalorder %s267_s28, %s1723_s13 }
  0x3c   : > { %s1728_s3 = sshll.u32 %s1858_s11, 4  ;;  %s1729_s3 = int_to_ptr.vmem [resolvable:$false] %s1728_s3 }
  0x3d   : > { %p1726_p0 = pnand %p1724_p13, %p1712_p2  ;;  %s1730_s16 = scalar_lea.vmem %s1729_s3, 256 }
  0x3e   : > { %p1731_p10 = scmp.lt.s32.totalorder %s267_s28, %s1729_s3  ;;  %p1732_p1 = scmp.lt.s32.totalorder %s1730_s16, %s1723_s13 }
  0x3f   : > { %p1727_p5 = pneg %p1726_p0 }
  0x40   : > { %p1733_p4 = por %p1732_p1, %p1731_p10 }
  0x42   : > { %p1734_p6 = pnand %p1733_p4, %p1727_p5 }
  0x44   : > { %1737 = shalt.err (!%p1734_p6)
}
  0x45   : > { %1559 = dma.hbm_to_vmem [thread:$0]  (!%p2024_p11), %s264_s20, 128, %s267_s28, %s256_s1  }
  0x46   : > { %275 = sbr.rel (%p1967_p8) target bundleno = 1453 (0x5ad), region = 40  ;;  %s2035_s15 = sand.u32 (!%p1967_p8), 1, %s1836_s22  }
  0x47   : > { %s1418_s14 = sshll.u32 (!%p1967_p8), %s2035_s15, 3  ;;  %s278_s18 = scalar_lea.sflag (!%p1967_p8), [#allocation7], %s2035_s15 }
  0x48   : > { %s281_s3 = scalar_lea.vmem (!%p1967_p8), [#allocation6], %s1418_s14  ;;  %p2256_p12 = scmp.ne.s32.totalorder (!%p1967_p8), %s2248_s7, 0 }
  0x4b   : > { %1815 = dma.done.wait (%p2256_p12), %s278_s18, 128  }
  0x4c   : > { %1817 = vsyncadd (%p2256_p12), %s278_s18, 4294967168  ;;  %p2257_p3 = scmp.ne.s32.totalorder %s2246_s29, 0 }
  0x4e   : > { %1819 = dma.done.wait (%p2257_p3), [#allocation10], 1024  }
  0x4f   : > { %1821 = vsyncadd (%p2257_p3), [#allocation10], 4294966272  ;;  %v1859_v0 = vmov 0.0   ;;  %vm1860_vm0 = vmmov 0   ;;  %v331_v1 = vld [vmem:[#allocation9 + $0x18] sm:$0xff]  ;;  %v330_v2 = vld [vmem:[#allocation9 + $0x10] sm:$0xff] }
  0x50   : > { %1473 = vmatprep.subr.mxu0 %v1859_v0  ;;  %1481 = vmatprep.mubr.msk.f32.mxu0 %vm1860_vm0, %v1859_v0  ;;  %v329_v3 = vld [vmem:[#allocation9 + $0x8] sm:$0xff]  ;;  %v328_v4 = vld [vmem:[#allocation9] sm:$0xff]  ;;  %v327_v5 = vld [vmem:[%s281_s3] sm:$0xff]  ;;  %vm339_vm1 = vcmask 261120   ;;  %vm413_vm2 = vcmask 64512   ;;  %s1861_s7 = smov 120  }
  0x51   : > { %1484 = vmatprep.subr.mxu1 %v1859_v0  ;;  %1486 = vmatprep.mubr.msk.f32.mxu1 %vm1860_vm0, %v1859_v0  ;;  %v1423_v6 = vld [vmem:[%s2236_s2] ss:$0 sm:$0xff]  ;;  %s1862_s9 = smov 96   ;;  %s1863_s19 = smov 80   ;;  %vm1137_vm3 = vcmask 130112   ;;  %vm1143_vm4 = vcmask 195712  }
  0x52   : > { %1474 = vmatpush3.msra.mxu0 %v331_v1  ;;  %s1864_s20 = smov 88   ;;  %s1865_s27 = smov 72   ;;  %vm1149_vm5 = vcmask 261312  }
  0x53   : > { %1475 = vmatprep.subr.mxu0 %v1859_v0  ;;  %s1866_s28 = smov 112   ;;  %s1867_s30 = smov 104  }
  0x54   : > { %1476 = vmatpush3.msra.mxu0 %v330_v2  ;;  %s1868_s13 = smov 56   ;;  %s1869_s11 = smov 64  }
  0x55   : > { %1477 = vmatprep.subr.mxu0 %v1859_v0  ;;  %s1870_s16 = smov 48   ;;  %s1871_s18 = smov 40  }
  0x56   : > { %1478 = vmatpush3.msra.mxu0 %v329_v3  ;;  %s1422_s3 = sshll.u32 %s2035_s15, 5  ;;  %s1872_s29 = smov 8  }
  0x57   : > { %1479 = vmatprep.subr.mxu0 %v1859_v0  ;;  %s2122_s1 = scalar_lea.vmem [#allocation13], %s1422_s3 }
  0x58   : > { %1480 = vmatpush3.msra.mxu0 %v328_v4 }
  0x59   : > { %1482 = vmatmul.mubr.msk.f32.vlgmr.msra.gmra.mxu0 %vm339_vm1, %v327_v5  ;;  %1504 = vmatprep.subr.mxu0 %v1859_v0 }
  0x5a   : > { %1506 = vmatprep.mubr.msk.f32.mxu0 %vm1860_vm0, %v1859_v0 }
 0x119   : > { %v409_v7 = vpop.f32.mrf.mxu0 }
 0x11a   : > { %v2065_v8 = vadd.f32 %v1423_v6, %v409_v7 }
 0x11b   : > { %v1483_v9 = vpop.f32.mrf.mxu0 }
 0x11c   : > { %424 = vrot.lane.b32.xlu1 %v2065_v8, %s1861_s7  ;;  %416 = vrot.lane.b32.xlu0 %v2065_v8, %s1862_s9  ;;  %414 = vst.msk [vmem:[#allocation2] sm:$0xff] %vm413_vm2, %v2065_v8  ;;  %s1873_s7 = smov 16   ;;  %s1874_s9 = smov 24  }
 0x120   : > { %444 = vrot.lane.b32.xlu1 %v2065_v8, %s1863_s19  ;;  %429 = vrot.lane.b32.xlu0 %v2065_v8, %s1864_s20  ;;  %s1446_s19 = sshll.u32 %s1844_s24, 9  ;;  %s1272_s20 = sshll.u32 %s2122_s1, 4  ;;  %s2156_s20 = int_to_ptr.vmem [resolvable:$true] %s1272_s20 }
 0x123   : > { %v471_v17 = vld [vmem:[#allocation2] sm:$0xff] }
 0x124   : > { %459 = vrot.lane.b32.xlu1 %v2065_v8, %s1865_s27  ;;  %439 = vrot.lane.b32.xlu0 %v2065_v8, %s1866_s28 }
 0x128   : > { %454 = vrot.lane.b32.xlu0 %v2065_v8, %s1867_s30  ;;  %s2154_s30 = scalar_lea.hbm %s2240_s6, %s1446_s19 }
 0x18e   : > { %v425_v10 = vpop.permute.xlu1 %424  ;;  %v417_v11 = vpop.permute.xlu0 %416 }
 0x18f   : > { %428 = vst.msk [vmem:[#allocation2 + $0x8] sm:$0xff] %vm413_vm2, %v425_v10  ;;  %419 = vst.msk [vmem:[#allocation3] sm:$0xff] %vm413_vm2, %v417_v11 }
 0x192   : > { %v445_v12 = vpop.permute.xlu1 %444  ;;  %v430_v13 = vpop.permute.xlu0 %429 }
 0x193   : > { %448 = vst.msk [vmem:[#allocation3 + $0x10] sm:$0xff] %vm413_vm2, %v445_v12  ;;  %433 = vst.msk [vmem:[#allocation3 + $0x8] sm:$0xff] %vm413_vm2, %v430_v13 }
 0x196   : > { %v460_v14 = vpop.permute.xlu1 %459  ;;  %v440_v15 = vpop.permute.xlu0 %439  ;;  %v475_v16 = vld [vmem:[#allocation3] sm:$0xff]  ;;  %v472_v20 = vld [vmem:[#allocation2 + $0x8] sm:$0xff] }
 0x197   : > { %463 = vst.msk [vmem:[#allocation3 + $0x18] sm:$0xff] %vm413_vm2, %v460_v14  ;;  %443 = vst.msk [vmem:[#allocation2 + $0x10] sm:$0xff] %vm413_vm2, %v440_v15  ;;  %1485 = vmatpush3.xpose.msk.msra.mxu1 %vm413_vm2, %v475_v16 }
 0x198   : > { %1489 = vmatprep.subr.mxu1 %v1859_v0 }
 0x19a   : > { %v455_v18 = vpop.permute.xlu0 %454  ;;  %1487 = vmatmul.mubr.msk.f32.vlgmr.msra.gmra.mxu1 %vm413_vm2, %v471_v17  ;;  %v476_v19 = vld [vmem:[#allocation3 + $0x8] sm:$0xff]  ;;  %v477_v21 = vld [vmem:[#allocation3 + $0x10] sm:$0xff] }
 0x19b   : > { %458 = vst.msk [vmem:[#allocation2 + $0x18] sm:$0xff] %vm413_vm2, %v455_v18  ;;  %1490 = vmatpush3.xpose.msk.msra.mxu1 %vm413_vm2, %v476_v19  ;;  %1491 = vmatprep.mubr.msk.f32.mxu1 %vm1860_vm0, %v1859_v0  ;;  %v1155_v19 = vld [vmem:[#allocation11 + $0x18] sm:$0xff] }
 0x19c   : > { %1494 = vmatprep.subr.mxu1 %v1859_v0 }
 0x19e   : > { %1492 = vmatmul.mubr.msk.f32.vlgmr.msra.gmra.mxu1 %vm413_vm2, %v472_v20  ;;  %v473_v22 = vld [vmem:[#allocation2 + $0x10] sm:$0xff]  ;;  %v478_v23 = vld [vmem:[#allocation3 + $0x18] sm:$0xff]  ;;  %v1154_v20 = vld [vmem:[#allocation11 + $0x10] sm:$0xff] }
 0x19f   : > { %1495 = vmatpush3.xpose.msk.msra.mxu1 %vm413_vm2, %v477_v21  ;;  %1496 = vmatprep.mubr.msk.f32.mxu1 %vm1860_vm0, %v1859_v0 }
 0x1a0   : > { %1499 = vmatprep.subr.mxu1 %v1859_v0 }
 0x1a2   : > { %1497 = vmatmul.mubr.msk.f32.vlgmr.msra.gmra.mxu1 %vm413_vm2, %v473_v22  ;;  %v474_v24 = vld [vmem:[#allocation2 + $0x18] sm:$0xff]  ;;  %v1153_v22 = vld [vmem:[#allocation11 + $0x8] sm:$0xff] }
 0x1a3   : > { %1500 = vmatpush3.xpose.msk.msra.mxu1 %vm413_vm2, %v478_v23  ;;  %1501 = vmatprep.mubr.msk.f32.mxu1 %vm1860_vm0, %v1859_v0 }
 0x1a4   : > { %1509 = vmatprep.subr.mxu1 %v1859_v0 }
 0x1a6   : > { %1502 = vmatmul.mubr.msk.f32.vlgmr.msra.gmra.mxu1 %vm413_vm2, %v474_v24  ;;  %v1152_v24 = vld [vmem:[#allocation11] sm:$0xff] }
 0x1a7   : > { %1511 = vmatprep.mubr.msk.f32.mxu1 %vm1860_vm0, %v1859_v0 }
 0x25a   : > { %v556_v25 = vpop.f32.mrf.mxu1 }
 0x25b   : > { %v788_v26 = vmul.f32 0.35355338, %v556_v25 }
 0x25c   : > { %v1488_v27 = vpop.f32.mrf.mxu1 }
 0x25d   : > { %v792_v28 = vsel %vm413_vm2, %v788_v26, -inf }
 0x25e   : > { %793 = vmax.xlane.f32.xlu1 %v792_v28  ;;  %v632_v29 = vpop.f32.mrf.mxu1 }
 0x25f   : > { %v789_v30 = vmul.f32 0.35355338, %v632_v29 }
 0x260   : > { %v1493_v31 = vpop.f32.mrf.mxu1 }
 0x261   : > { %v795_v32 = vsel %vm413_vm2, %v789_v30, -inf }
 0x262   : > { %796 = vmax.xlane.f32.xlu0 %v795_v32  ;;  %v708_v33 = vpop.f32.mrf.mxu1 }
 0x263   : > { %v790_v34 = vmul.f32 0.35355338, %v708_v33 }
 0x264   : > { %v1498_v35 = vpop.f32.mrf.mxu1 }
 0x265   : > { %v798_v36 = vsel %vm413_vm2, %v790_v34, -inf }
 0x266   : > { %799 = vmax.xlane.f32.xlu0 %v798_v36  ;;  %v784_v37 = vpop.f32.mrf.mxu1 }
 0x267   : > { %v791_v38 = vmul.f32 0.35355338, %v784_v37 }
 0x268   : > { %v1503_v39 = vpop.f32.mrf.mxu1 }
 0x269   : > { %v801_v40 = vsel %vm413_vm2, %v791_v38, -inf }
 0x26a   : > { %802 = vmax.xlane.f32.xlu1 %v801_v40 }
 0x27b   : > { %434 = vrot.lane.b32.xlu1 %v2065_v8, %s1868_s13  ;;  %s1244_s13 = scalar_lea.sflag [#allocation14], %s2035_s15 }
 0x27c   : > { %420 = vrot.lane.b32.xlu0 %v2065_v8, %s1869_s11  ;;  %s1738_s11 = scalar_lea.vmem %s2156_s20, 512 }
 0x27d   : > { %p1739_p8 = scmp.ne.s32.totalorder %s2156_s20, %s1738_s11 }
 0x27f   : > { %p1740_p9 = pnand %p1739_p8, %p2008_p7 }
 0x281   : > { %p1741_p11 = pneg %p1740_p9 }
 0x2e7   : > { %v794_v41 = vpop.xlane.xlu1 %793 }
 0x2e8   : > { %v804_v42 = vsub.f32 %v788_v26, %v794_v41 }
 0x2ea   : > { %v808_v43 = vmul.f32 1.442695, %v804_v42 }
 0x2eb   : > { %v797_v44 = vpop.xlane.xlu0 %796 }
 0x2ec   : > { %1642 = vpow2.f32 %v808_v43  ;;  %v805_v45 = vsub.f32 %v789_v30, %v797_v44 }
 0x2ee   : > { %v810_v46 = vmul.f32 1.442695, %v805_v45 }
 0x2ef   : > { %v800_v47 = vpop.xlane.xlu0 %799 }
 0x2f0   : > { %1644 = vpow2.f32 %v810_v46  ;;  %v806_v48 = vsub.f32 %v790_v34, %v800_v47 }
 0x2f2   : > { %v812_v49 = vmul.f32 1.442695, %v806_v48 }
 0x2f3   : > { %v421_v50 = vpop.permute.xlu0 %420  ;;  %v803_v51 = vpop.xlane.xlu1 %802 }
 0x2f4   : > { %1646 = vpow2.f32 %v812_v49  ;;  %423 = vst.msk [vmem:[#allocation4] sm:$0xff] %vm413_vm2, %v421_v50  ;;  %v807_v52 = vsub.f32 %v791_v38, %v803_v51 }
 0x2f6   : > { %v814_v53 = vmul.f32 1.442695, %v807_v52 }
 0x2f7   : > { %v435_v54 = vpop.permute.xlu1 %434 }
 0x2f8   : > { %1648 = vpow2.f32 %v814_v53  ;;  %438 = vst.msk [vmem:[#allocation4 + $0x8] sm:$0xff] %vm413_vm2, %v435_v54 }
 0x2f9   : > { %v1643_v55 = vpop.eup %1642 }
 0x2fa   : > { %v816_v56 = vsel %vm413_vm2, %v1643_v55, 0.0 }
 0x2fb   : > { %817 = vadd.xlane.f32.xlu0 %v816_v56  ;;  %v479_v57 = vld [vmem:[#allocation4] sm:$0xff] }
 0x2fc   : > { %1505 = vmatpush3.msra.mxu0 %v479_v57 }
 0x2fd   : > { %v1645_v58 = vpop.eup %1644  ;;  %1514 = vmatprep.subr.mxu0 %v1859_v0 }
 0x2fe   : > { %v819_v59 = vsel %vm413_vm2, %v1645_v58, 0.0 }
 0x2ff   : > { %820 = vadd.xlane.f32.xlu1 %v819_v59  ;;  %v480_v60 = vld [vmem:[#allocation4 + $0x8] sm:$0xff] }
 0x300   : > { %1510 = vmatpush3.msra.mxu1 %v480_v60 }
 0x301   : > { %v1647_v61 = vpop.eup %1646  ;;  %1519 = vmatprep.subr.mxu1 %v1859_v0 }
 0x302   : > { %v822_v62 = vsel %vm413_vm2, %v1647_v61, 0.0 }
 0x303   : > { %823 = vadd.xlane.f32.xlu0 %v822_v62 }
 0x305   : > { %v1649_v63 = vpop.eup %1648 }
 0x306   : > { %v825_v1 = vsel %vm413_vm2, %v1649_v63, 0.0 }
 0x307   : > { %826 = vadd.xlane.f32.xlu1 %v825_v1 }
 0x318   : > { %449 = vrot.lane.b32.xlu1 %v2065_v8, %s1870_s16  ;;  %s1875_s16 = smov [#allocation13]  }
 0x319   : > { %464 = vrot.lane.b32.xlu0 %v2065_v8, %s1871_s18  ;;  %s1742_s18 = sshll.u32 %s1875_s16, 4  ;;  %s1743_s18 = int_to_ptr.vmem [resolvable:$false] %s1742_s18 }
 0x31a   : > { %s1744_s3 = scalar_lea.vmem %s1743_s18, 1024  ;;  %p1745_p2 = scmp.lt.s32.totalorder %s2156_s20, %s1743_s18 }
 0x31b   : > { %p1746_p13 = scmp.lt.s32.totalorder %s1744_s3, %s1738_s11 }
 0x31d   : > { %p1747_p0 = por %p1746_p13, %p1745_p2 }
 0x31f   : > { %p1748_p5 = pnand %p1747_p0, %p1741_p11 }
 0x384   : > { %v818_v2 = vpop.xlane.xlu0 %817 }
 0x385   : > { %1650 = vrcp.f32 %v818_v2 }
 0x388   : > { %v821_v3 = vpop.xlane.xlu1 %820 }
 0x389   : > { %1652 = vrcp.f32 %v821_v3 }
 0x38c   : > { %v824_v4 = vpop.xlane.xlu0 %823 }
 0x38d   : > { %1654 = vrcp.f32 %v824_v4 }
 0x390   : > { %v465_v5 = vpop.permute.xlu0 %464  ;;  %v827_v6 = vpop.xlane.xlu1 %826 }
 0x391   : > { %468 = vst.msk [vmem:[#allocation4 + $0x18] sm:$0xff] %vm413_vm2, %v465_v5  ;;  %1656 = vrcp.f32 %v827_v6 }
 0x392   : > { %v1651_v7 = vpop.eup %1650 }
 0x393   : > { %v832_v9 = vmul.f32 %v1651_v7, %v1643_v55 }
 0x394   : > { %v450_v10 = vpop.permute.xlu1 %449 }
 0x395   : > { %453 = vst.msk [vmem:[#allocation4 + $0x10] sm:$0xff] %vm413_vm2, %v450_v10  ;;  %836 = vst.msk [vmem:[%s2122_s1] sm:$0xff] %vm413_vm2, %v832_v9  ;;  %1507 = vmatmul.mubr.msk.f32.vlgmr.msra.gmra.mxu0 %vm413_vm2, %v832_v9 }
 0x396   : > { %v1653_v8 = vpop.eup %1652  ;;  %1516 = vmatprep.mubr.msk.f32.mxu0 %vm1860_vm0, %v1859_v0 }
 0x397   : > { %v833_v11 = vmul.f32 %v1653_v8, %v1645_v58 }
 0x398   : > { %v482_v12 = vld [vmem:[#allocation4 + $0x18] sm:$0xff] }
 0x399   : > { %837 = vst.msk [vmem:[%s2122_s1 + $0x8] sm:$0xff] %vm413_vm2, %v833_v11  ;;  %1512 = vmatmul.mubr.msk.f32.vlgmr.msra.gmra.mxu1 %vm413_vm2, %v833_v11 }
 0x39a   : > { %v1655_v13 = vpop.eup %1654  ;;  %1520 = vmatpush3.msra.mxu1 %v482_v12  ;;  %1521 = vmatprep.mubr.msk.f32.mxu1 %vm1860_vm0, %v1859_v0 }
 0x39b   : > { %v834_v14 = vmul.f32 %v1655_v13, %v1647_v61 }
 0x39c   : > { %v481_v15 = vld [vmem:[#allocation4 + $0x10] sm:$0xff] }
 0x39d   : > { %1515 = vmatpush3.msra.mxu0 %v481_v15  ;;  %838 = vst.msk [vmem:[%s2122_s1 + $0x10] sm:$0xff] %vm413_vm2, %v834_v14 }
 0x39e   : > { %v1657_v16 = vpop.eup %1656  ;;  %1517 = vmatmul.mubr.msk.f32.vlgmr.msra.gmra.mxu0 %vm413_vm2, %v834_v14  ;;  %1524 = vmatprep.subr.mxu0 %v1859_v0 }
 0x39f   : > { %v835_v17 = vmul.f32 %v1657_v16, %v1649_v63  ;;  %1532 = vmatprep.mubr.msk.f32.mxu0 %vm1860_vm0, %v1859_v0  ;;  %1525 = vmatpush3.msra.mxu0 %v1155_v19 }
 0x3a0   : > { %1526 = vmatprep.subr.mxu0 %v1859_v0 }
 0x3a1   : > { %839 = vst.msk [vmem:[%s2122_s1 + $0x18] sm:$0xff] %vm413_vm2, %v835_v17  ;;  %1522 = vmatmul.mubr.msk.f32.vlgmr.msra.gmra.mxu1 %vm413_vm2, %v835_v17  ;;  %1527 = vmatpush3.msra.mxu0 %v1154_v20 }
 0x3a2   : > { %1528 = vmatprep.subr.mxu0 %v1859_v0 }
 0x3a3   : > { %1529 = vmatpush3.msra.mxu0 %v1153_v22 }
 0x3a4   : > { %1530 = vmatprep.subr.mxu0 %v1859_v0 }
 0x3a5   : > { %1531 = vmatpush3.msra.mxu0 %v1152_v24 }
 0x455   : > { %v909_v18 = vpop.f32.mrf.mxu0 }
 0x456   : > { %1132 = vst.msk [vmem:[#allocation5] sm:$0xff] %vm413_vm2, %v909_v18 }
 0x457   : > { %v1508_v21 = vpop.f32.mrf.mxu0 }
 0x459   : > { %v982_v23 = vpop.f32.mrf.mxu1 }
 0x45a   : > { %1134 = vrot.lane.b32.xlu1 %v982_v23, %s1872_s29 }
 0x45b   : > { %v1513_v25 = vpop.f32.mrf.mxu1 }
 0x45e   : > { %v1055_v26 = vpop.f32.mrf.mxu0 }
 0x45f   : > { %1140 = vrot.lane.b32.xlu0 %v1055_v26, %s1873_s7 }
 0x460   : > { %v1518_v27 = vpop.f32.mrf.mxu0 }
 0x461   : > { %v1128_v28 = vpop.f32.mrf.mxu1 }
 0x462   : > { %1146 = vrot.lane.b32.xlu1 %v1128_v28, %s1874_s9 }
 0x463   : > { %v1523_v29 = vpop.f32.mrf.mxu1 }
 0x4cc   : > { %v1135_v30 = vpop.permute.xlu1 %1134 }
 0x4cd   : > { %1138 = vst.msk [vmem:[#allocation5] sm:$0xff] %vm1137_vm3, %v1135_v30 }
 0x4d1   : > { %v1141_v31 = vpop.permute.xlu0 %1140 }
 0x4d2   : > { %1144 = vst.msk [vmem:[#allocation5] sm:$0xff] %vm1143_vm4, %v1141_v31 }
 0x4d4   : > { %v1147_v0 = vpop.permute.xlu1 %1146 }
 0x4d5   : > { %1150 = vst.msk [vmem:[#allocation5] sm:$0xff] %vm1149_vm5, %v1147_v0 }
 0x4dc   : > { %v1151_v32 = vld [vmem:[#allocation5] sm:$0xff] }
 0x4dd   : > { %1533 = vmatmul.mubr.msk.f32.vlgmr.msra.gmra.mxu0 %vm339_vm1, %v1151_v32 }
 0x4de   : > { %1751 = shalt.err (!%p1748_p5)
}
 0x4df   : > { %s1752_s1 = scalar_lea.hbm %s2154_s30, 512  ;;  %s1756_s19 = scalar_lea.hbm %s2240_s6, 1024 }
 0x4e0   : > { %p1753_p10 = scmp.ne.s32.totalorder %s2154_s30, %s1752_s1  ;;  %p1757_p6 = scmp.lt.s32.totalorder %s2154_s30, %s2240_s6 }
 0x4e1   : > { %p1758_p12 = scmp.lt.s32.totalorder %s1756_s19, %s1752_s1 }
 0x4e2   : > { %p1754_p1 = pnand %p1753_p10, %p2008_p7 }
 0x4e3   : > { %p1759_p3 = por %p1758_p12, %p1757_p6 }
 0x4e4   : > { %p1755_p4 = pneg %p1754_p1 }
 0x4e6   : > { %p1760_p8 = pnand %p1759_p3, %p1755_p4 }
 0x4e8   : > { %1763 = shalt.err (!%p1760_p8)
}
 0x4e9   : > { %s1876_s11 = smov 128   ;;  %v1437_v33 = vld [vmem:[%s2238_s4] ss:$0 sm:$0xff]  ;;  %s1441_s3 = sshll.u32 %s1844_s24, 7 }
 0x4ea   : > { %1546 = dma.vmem_to_hbm [thread:$0]  (%p2008_p7), %s2156_s20, 512, %s2154_s30, %s1244_s13, %s1876_s11, %s1876_s11, %s1872_s29  }
 0x4eb   : > { %s315_s1 = scalar_lea.vmem [#allocation12], %s1418_s14  ;;  %s2191_s27 = scalar_lea.hbm %s2239_s5, %s1441_s3 }
 0x4ec   : > { %s1258_s7 = sshll.u32 %s315_s1, 4  ;;  %s1239_s29 = scalar_lea.sflag [#allocation8], %s2035_s15  ;;  %s1259_s7 = int_to_ptr.vmem [resolvable:$true] %s1258_s7 }
 0x4ed   : > { %s1764_s20 = scalar_lea.vmem %s1259_s7, 128  ;;  %s1877_s24 = smov [#allocation12]  }
 0x4ee   : > { %p1765_p9 = scmp.ne.s32.totalorder %s1259_s7, %s1764_s20  ;;  %s1768_s14 = sshll.u32 %s1877_s24, 4  ;;  %s1769_s14 = int_to_ptr.vmem [resolvable:$false] %s1768_s14 }
 0x4ef   : > { %s1770_s30 = scalar_lea.vmem %s1769_s14, 256  ;;  %p1771_p13 = scmp.lt.s32.totalorder %s1259_s7, %s1769_s14 }
 0x4f0   : > { %p1766_p11 = pnand %p1765_p9, %p2008_p7  ;;  %p1772_p0 = scmp.lt.s32.totalorder %s1770_s30, %s1764_s20 }
 0x4f2   : > { %p1767_p2 = pneg %p1766_p11  ;;  %p1773_p5 = por %p1772_p0, %p1771_p13 }
 0x4f4   : > { %p1774_p10 = pnand %p1773_p5, %p1767_p2 }
 0x59d   : > { %v1233_v34 = vpop.f32.mrf.mxu0 }
 0x59e   : > { %v1234_v35 = vadd.f32 %v1437_v33, %v1233_v34 }
 0x59f   : > { %v1534_v36 = vpop.f32.mrf.mxu0 }
 0x5a0   : > { %1237 = vst.msk [vmem:[%s315_s1] sm:$0xff] %vm339_vm1, %v1234_v35 }
 0x5a1   : > { %1777 = shalt.err (!%p1774_p10)
}
 0x5a2   : > { %s1778_s13 = scalar_lea.hbm %s2191_s27, 128  ;;  %s1782_s11 = scalar_lea.hbm %s2239_s5, 256 }
 0x5a3   : > { %p1779_p1 = scmp.ne.s32.totalorder %s2191_s27, %s1778_s13  ;;  %p1783_p12 = scmp.lt.s32.totalorder %s2191_s27, %s2239_s5 }
 0x5a4   : > { %p1784_p3 = scmp.lt.s32.totalorder %s1782_s11, %s1778_s13 }
 0x5a5   : > { %p1780_p4 = pnand %p1779_p1, %p2008_p7 }
 0x5a6   : > { %p1785_p8 = por %p1784_p3, %p1783_p12 }
 0x5a7   : > { %p1781_p6 = pneg %p1780_p4 }
 0x5a9   : > { %p1786_p9 = pnand %p1785_p8, %p1781_p6 }
 0x5ab   : > { %1789 = shalt.err (!%p1786_p9)
}
 0x5ac   : > { %1545 = dma.vmem_to_hbm [thread:$0]  (%p2008_p7), %s1259_s7, 128, %s2191_s27, %s1239_s29  }
 0x5ad PF: > { %s1287_s3 = sand.u32 1, %s1832_s21   ;;  %p2258_p11 = scmp.ne.s32.totalorder %s2249_s8, 0 }
 0x5ae   : > { %p2259_p2 = scmp.ge.s32.totalorder %s1852_s26, 2  ;;  %s1288_s1 = scalar_lea.sflag [#allocation8], %s1287_s3 }
 0x5b0   : > { %p1561_p13 = pnand %p2259_p2, %p2258_p11 }
 0x5b2   : > { %p1562_p0 = pneg %p1561_p13 }
 0x5b4   : > { %1823 = dma.done.wait (%p1562_p0), %s1288_s1, 128  }
 0x5b5   : > { %1825 = vsyncadd (%p1562_p0), %s1288_s1, 4294967168  ;;  %s1297_s9 = scalar_lea.sflag [#allocation14], %s1287_s3 }
 0x5b6   : > { %1827 = dma.done.wait (%p1562_p0), %s1297_s9, 512  }
 0x5b7   : > { %1829 = vsyncadd (%p1562_p0), %s1297_s9, 4294966784  ;;  %s27_s26 = sadd.s32 1, %s1852_s26   ;;  %s2260_s21 = smov %s1836_s22 }
 0x5b8   : > { %p24_p5 = scmp.ge.s32.totalorder %s27_s26, 4   ;;  %s2261_s22 = smov %s1840_s23 }
 0x5b9   : > { %s2262_s23 = smov %s2017_s17  ;;  %s2263_s24 = smov %s1848_s25 }
 0x5ba   : > { %s2264_s25 = smov %s2266_s10  ;;  %26 = sbr.rel (!%p24_p5) target bundleno = 12 (0xc), region = 124 }
 0x5bf   :  { %1302 = vsyncpa [#allocation7], 1 }
 0x5c0   :  { %1304 = vsyncpa [#allocation7 + $0x1], 1 }
 0x5c1   :  { %1305 = vsyncpa [#allocation10], 1 }
 0x5c2   :  { %1306 = vsyncpa [#allocation8], 1 }
 0x5c3   :  { %1308 = vsyncpa [#allocation8 + $0x1], 1 }
 0x5c4   :  { %1309 = vsyncpa [#allocation14], 1 }
 0x5c5   :  { %1311 = vsyncpa [#allocation14 + $0x1], 1 }

</bundles_post_ra>
